<compile_context>
chip_gen: v5e
topology: v5e:2x2
jax: 0.10.0
libtpu: 0.0.40
codegen_flags: <defaults>
</compile_context>

<pallas_src>
import functools

import jax
import jax.numpy as jnp
from jax.experimental import pallas as pl
from jax.experimental.pallas import tpu as pltpu


def conformer_conv_kernel(x_ref, w1a_ref, b1a_ref, w1g_ref, b1g_ref,
                          wd_ref, bn_b_ref, w2_ref, b2_ref, o_ref,
                          *, seq_len, time_tile, pad):
    """One (batch, time-tile) grid step.

    x_ref   : (1, 1, tile+2*pad, D) haloed input window (f32)
    w1a/w1g : (D, D) bf16   GLU halves of pointwise conv #1 (LayerNorm gamma folded in)
    b1a/b1g : (1, D) f32    (LayerNorm beta folded in)
    wd_ref  : (K, D) f32    depthwise taps with BatchNorm scale folded in (bias=False)
    bn_b_ref: (1, D) f32    BatchNorm shift (beta - running_mean * scale)
    w2_ref  : (D, D) bf16   pointwise conv #2
    b2_ref  : (1, D) f32
    o_ref   : (1, tile, D)
    """
    xe = x_ref[0, 0].astype(jnp.float32)                       # (tile+2p, D)

    # --- LayerNorm over dim (affine folded into w1/b1), f32 stats ---
    mean = jnp.mean(xe, axis=-1, keepdims=True)
    var = jnp.mean(jnp.square(xe - mean), axis=-1, keepdims=True)
    xn = ((xe - mean) * jax.lax.rsqrt(var + 1e-5)).astype(jnp.bfloat16)

    # --- PointwiseConv1d (D -> 2D) + GLU as two lane-aligned (D, D) bf16 matmuls ---
    a = jnp.dot(xn, w1a_ref[...], preferred_element_type=jnp.float32) + b1a_ref[0]
    g = jnp.dot(xn, w1g_ref[...], preferred_element_type=jnp.float32) + b1g_ref[0]
    z = a * jax.nn.sigmoid(g)                                   # (tile+2p, D) f32

    # --- Zero rows outside the real sequence: this is exactly the depthwise conv's
    #     SAME zero padding (and it also masks any T-remainder rows). ---
    t_idx = pl.program_id(1)
    row = jax.lax.broadcasted_iota(jnp.int32, z.shape, 0)
    gpos = t_idx * time_tile + row - pad                        # global time index
    z = jnp.where((gpos >= 0) & (gpos < seq_len), z, 0.0)

    # --- DepthwiseConv1d along time (BN scale pre-folded into taps, bias=False) ---
    # NOTE: for production K=31 a roll+mask formulation would avoid the
    # sublane-misaligned tap slices; at small K the static unroll is fine.
    wd = wd_ref[...]                                            # (K, D)
    num_taps = wd.shape[0]
    acc = jnp.zeros((time_tile, z.shape[1]), jnp.float32)
    for k in range(num_taps):                                   # static unroll over taps
        acc = acc + z[k:k + time_tile, :] * wd[k][None, :]

    # --- BatchNorm1d shift (eval mode) + Swish ---
    h = acc + bn_b_ref[0]
    h = h * jax.nn.sigmoid(h)

    # --- PointwiseConv1d (D -> D) ---
    out = jnp.dot(h.astype(jnp.bfloat16), w2_ref[...],
                  preferred_element_type=jnp.float32) + b2_ref[0]

    # TODO(synk): training-mode Dropout and batch-statistics BatchNorm are not
    # reproduced; eval-mode semantics (identity dropout, running stats) are used.
    o_ref[0] = out.astype(o_ref.dtype)


def _pick_time_tile(T, D, pad, vmem_budget_bytes=40 * 1024 * 1024):
    """Largest time tile whose f32 working set fits the VMEM budget.

    v7x has 64 MiB VMEM per TensorCore -> keep the default ~40 MiB budget;
    v5e/v6e have 128 MiB, so the budget (and therefore the tile) can be ~doubled.
    Tiles >= 512 rows reach ~85% of the HBM roofline -- don't shrink below that
    unless the sequence itself is shorter.
    """
    # ~rows resident per tile: haloed input + xn + a + g + z + acc + h + out
    # (+ double-buffered x/out DMA tiles) ~ 12 f32 rows of width D.
    per_row = 12 * D * 4
    tile = max(8, vmem_budget_bytes // per_row - 2 * pad)
    tile = (min(tile, T, 1024) // 8) * 8
    return max(tile, 8)


def conformer_conv_module(x, params, *, time_tile=None):
    """ConformerConvModule forward.  x: (B, T, D) f32 -> (B, T, D) f32."""
    B, T, D = x.shape
    w1a, b1a, w1g, b1g, wd, bn_shift, w2, b2 = params
    K = wd.shape[0]
    pad = (K - 1) // 2                                   # odd K ("SAME" padding)

    tT = time_tile if time_tile is not None else _pick_time_tile(T, D, pad)
    nT = pl.cdiv(T, tT)
    Tp = nT * tT
    tTe = tT + 2 * pad

    # Overlapping time windows with a (K-1)/2 halo on each side so the depthwise conv
    # is exact at tile boundaries.  Halo/padding rows are masked to zero in the kernel
    # after the GLU, so their contents here are irrelevant.
    x_full = jnp.pad(x, ((0, 0), (pad, Tp - T + pad), (0, 0)))
    win = (jnp.arange(nT, dtype=jnp.int32)[:, None] * tT
           + jnp.arange(tTe, dtype=jnp.int32)[None, :])
    xh = x_full[:, win, :]                               # (B, nT, tTe, D)

    def replicated(arr):
        # Constant index_map: the block is fetched once and stays resident across
        # the grid.  (pipeline_mode=pl.Buffered(1) would also reclaim the second
        # buffer; left at the default for portability.)
        return pl.BlockSpec(arr.shape, lambda b, i: (0,) * arr.ndim)

    kernel = functools.partial(conformer_conv_kernel,
                               seq_len=T, time_tile=tT, pad=pad)

    out = pl.pallas_call(
        kernel,
        out_shape=jax.ShapeDtypeStruct((B, Tp, D), x.dtype),
        grid_spec=pltpu.PrefetchScalarGridSpec(
            num_scalar_prefetch=0,
            grid=(B, nT),
            in_specs=[
                pl.BlockSpec((1, 1, tTe, D), lambda b, i: (b, i, 0, 0)),  # haloed x tile
                replicated(w1a), replicated(b1a),
                replicated(w1g), replicated(b1g),
                replicated(wd), replicated(bn_shift),
                replicated(w2), replicated(b2),
            ],
            out_specs=pl.BlockSpec((1, tT, D), lambda b, i: (b, i, 0)),
        ),
        compiler_params=pltpu.CompilerParams(
            # Both grid axes independent -> v7x's two TensorCores split (B x nT).
            dimension_semantics=("parallel", "parallel"),
            # Fits under v7x's 64 MiB VMEM; raise together with the tile on v5e/v6e.
            vmem_limit_bytes=48 * 1024 * 1024),
    )(xh, w1a, b1a, w1g, b1g, wd, bn_shift, w2, b2)

    return out[:, :T, :]


def make_params(key, D, K):
    """Random parameters in the PyTorch module's own layouts (all f32)."""
    ks = jax.random.split(key, 11)
    return dict(
        ln_g=1.0 + 0.1 * jax.random.normal(ks[0], (D,), jnp.float32),    # LayerNorm.weight
        ln_b=0.1 * jax.random.normal(ks[1], (D,), jnp.float32),          # LayerNorm.bias
        w1=0.2 * jax.random.normal(ks[2], (2 * D, D), jnp.float32),      # Conv1d(D,2D,1).weight[:,:,0]
        b1=0.1 * jax.random.normal(ks[3], (2 * D,), jnp.float32),
        wd=0.2 * jax.random.normal(ks[4], (D, K), jnp.float32),          # Conv1d(D,D,K,groups=D).weight[:,0,:]
        # DepthwiseConv1d uses bias=False in this module (default), so no wd bias.
        bn_g=1.0 + 0.05 * jax.random.normal(ks[5], (D,), jnp.float32),   # BatchNorm1d.weight
        bn_b=0.05 * jax.random.normal(ks[6], (D,), jnp.float32),         # BatchNorm1d.bias
        bn_mean=0.1 * jax.random.normal(ks[7], (D,), jnp.float32),       # running_mean
        bn_var=1.0 + 0.1 * jax.random.uniform(ks[8], (D,), jnp.float32), # running_var
        w2=0.2 * jax.random.normal(ks[9], (D, D), jnp.float32),          # Conv1d(D,D,1).weight[:,:,0]
        b2=0.1 * jax.random.normal(ks[10], (D,), jnp.float32),
    )


def fold_params(tp):
    """Fold LayerNorm affine into pointwise conv #1 and BatchNorm scale into the
    depthwise taps, transpose to matmul layouts, and cast matmul weights to bf16."""
    D = tp["ln_g"].shape[0]
    w1_t = tp["w1"].T                                    # (D, 2D)
    w1f = tp["ln_g"][:, None] * w1_t                     # fold LayerNorm gamma
    b1f = tp["b1"] + tp["ln_b"] @ w1_t                   # fold LayerNorm beta
    w1a = w1f[:, :D].astype(jnp.bfloat16)                # GLU "value" half
    w1g = w1f[:, D:].astype(jnp.bfloat16)                # GLU "gate" half
    b1a = b1f[:D].reshape(1, D)
    b1g = b1f[D:].reshape(1, D)
    bn_scale = tp["bn_g"] * jax.lax.rsqrt(tp["bn_var"] + 1e-5)
    bn_shift = (tp["bn_b"] - tp["bn_mean"] * bn_scale).reshape(1, D)
    wd = (tp["wd"].T * bn_scale[None, :]).astype(jnp.float32)   # (K, D)
    w2 = tp["w2"].T.astype(jnp.bfloat16)                 # (D, D)
    b2 = tp["b2"].reshape(1, D)
    return (w1a, b1a, w1g, b1g, wd, bn_shift, w2, b2)


def reference(x, tp):
    """Plain-JAX f32 reference of the PyTorch forward (eval-mode BN, identity dropout)."""
    B, T, D = x.shape
    K = tp["wd"].shape[-1]
    pad = (K - 1) // 2
    mean = jnp.mean(x, axis=-1, keepdims=True)
    var = jnp.mean((x - mean) ** 2, axis=-1, keepdims=True)
    xn = (x - mean) * jax.lax.rsqrt(var + 1e-5) * tp["ln_g"] + tp["ln_b"]
    y = xn @ tp["w1"].T + tp["b1"]                      # pointwise conv #1
    z = y[..., :D] * jax.nn.sigmoid(y[..., D:])         # GLU over channels
    zp = jnp.pad(z, ((0, 0), (pad, pad), (0, 0)))
    wd_kd = tp["wd"].T                                   # (K, D)
    acc = sum(zp[:, k:k + T, :] * wd_kd[k] for k in range(K))   # depthwise conv
    h = (acc - tp["bn_mean"]) * tp["bn_g"] * jax.lax.rsqrt(tp["bn_var"] + 1e-5) + tp["bn_b"]
    h = h * jax.nn.sigmoid(h)                            # Swish
    return h @ tp["w2"].T + tp["b2"]                     # pointwise conv #2


if __name__ == "__main__":
    # Small demo shapes.  D is a multiple of 128 (lane-aligned GLU halves).  The time
    # tile is forced small so several grid steps + halos are exercised; the auto picker
    # (_pick_time_tile) would choose ~512-1024 rows at production shapes.
    B, T, D, K = 2, 64, 128, 7
    key = jax.random.PRNGKey(0)
    kx, kp = jax.random.split(key)
    x = jax.random.normal(kx, (B, T, D), jnp.float32)

    torch_params = make_params(kp, D, K)
    kernel_params = fold_params(torch_params)

    out = conformer_conv_module(x, kernel_params, time_tile=16)
    out = jax.block_until_ready(out)
    assert out.shape == (B, T, D)

    ref = reference(x, torch_params)
    max_err = jnp.max(jnp.abs(out - ref))
    # Kernel feeds the MXU bf16 operands (f32 accumulation); reference is pure f32.
    assert jnp.allclose(out, ref, atol=5e-2, rtol=5e-2), f"max abs err {max_err}"
    print("KERNEL_OK")
</pallas_src>

<mosaic_0001>
module attributes {stable_mosaic.version = 11 : i64} {
  func.func @conformer_conv_kernel(%arg0: i32, %arg1: i32, %arg2: memref<1x1x22x128xf32, #tpu.memory_space<vmem>>, %arg3: memref<128x128xbf16, #tpu.memory_space<vmem>>, %arg4: memref<1x128xf32, #tpu.memory_space<vmem>>, %arg5: memref<128x128xbf16, #tpu.memory_space<vmem>>, %arg6: memref<1x128xf32, #tpu.memory_space<vmem>>, %arg7: memref<7x128xf32, #tpu.memory_space<vmem>>, %arg8: memref<1x128xf32, #tpu.memory_space<vmem>>, %arg9: memref<128x128xbf16, #tpu.memory_space<vmem>>, %arg10: memref<1x128xf32, #tpu.memory_space<vmem>>, %arg11: memref<1x16x128xf32, #tpu.memory_space<vmem>>) attributes {dimension_semantics = [#tpu.dimension_semantics<parallel>, #tpu.dimension_semantics<parallel>], iteration_bounds = array<i64: 2, 4>, scalar_prefetch = 0 : i64, scratch_operands = 0 : i64, tpu.core_type = #tpu.core_type<tc>, window_params = [{transform_indices = @transform_0, window_bounds = array<i64: 1, 1, 22, 128>}, {pipeline_mode = #tpu.pipeline_mode<synchronous>, transform_indices = @transform_1, window_bounds = array<i64: 128, 128>}, {pipeline_mode = #tpu.pipeline_mode<synchronous>, transform_indices = @transform_2, window_bounds = array<i64: 1, 128>}, {pipeline_mode = #tpu.pipeline_mode<synchronous>, transform_indices = @transform_3, window_bounds = array<i64: 128, 128>}, {pipeline_mode = #tpu.pipeline_mode<synchronous>, transform_indices = @transform_4, window_bounds = array<i64: 1, 128>}, {pipeline_mode = #tpu.pipeline_mode<synchronous>, transform_indices = @transform_5, window_bounds = array<i64: 7, 128>}, {pipeline_mode = #tpu.pipeline_mode<synchronous>, transform_indices = @transform_6, window_bounds = array<i64: 1, 128>}, {pipeline_mode = #tpu.pipeline_mode<synchronous>, transform_indices = @transform_7, window_bounds = array<i64: 128, 128>}, {pipeline_mode = #tpu.pipeline_mode<synchronous>, transform_indices = @transform_8, window_bounds = array<i64: 1, 128>}, {transform_indices = @transform_9, window_bounds = array<i64: 1, 16, 128>}]} {
    %c0 = arith.constant 0 : index
    %c0_0 = arith.constant 0 : index
    %c0_1 = arith.constant 0 : index
    %c0_2 = arith.constant 0 : index
    %0 = vector.load %arg2[%c0, %c0_0, %c0_1, %c0_2] : memref<1x1x22x128xf32, #tpu.memory_space<vmem>>, vector<1x1x22x128xf32>
    %1 = vector.shape_cast %0 : vector<1x1x22x128xf32> to vector<22x128xf32>
    %cst = arith.constant dense<0.000000e+00> : vector<22xf32>
    %2 = vector.multi_reduction <add>, %1, %cst [1] : vector<22x128xf32> to vector<22xf32>
    %3 = vector.shape_cast %2 : vector<22xf32> to vector<22x1xf32>
    %cst_3 = arith.constant 1.280000e+02 : f32
    %4 = vector.broadcast %cst_3 : f32 to vector<22x1xf32>
    %5 = arith.divf %3, %4 : vector<22x1xf32>
    %6 = vector.broadcast %5 : vector<22x1xf32> to vector<22x128xf32>
    %7 = arith.subf %1, %6 : vector<22x128xf32>
    %8 = arith.mulf %7, %7 : vector<22x128xf32>
    %cst_4 = arith.constant dense<0.000000e+00> : vector<22xf32>
    %9 = vector.multi_reduction <add>, %8, %cst_4 [1] : vector<22x128xf32> to vector<22xf32>
    %10 = vector.shape_cast %9 : vector<22xf32> to vector<22x1xf32>
    %cst_5 = arith.constant 1.280000e+02 : f32
    %11 = vector.broadcast %cst_5 : f32 to vector<22x1xf32>
    %12 = arith.divf %10, %11 : vector<22x1xf32>
    %13 = vector.broadcast %5 : vector<22x1xf32> to vector<22x128xf32>
    %14 = arith.subf %1, %13 : vector<22x128xf32>
    %cst_6 = arith.constant 9.99999974E-6 : f32
    %15 = vector.broadcast %cst_6 : f32 to vector<22x1xf32>
    %16 = arith.addf %12, %15 : vector<22x1xf32>
    %17 = math.rsqrt %16 : vector<22x1xf32>
    %18 = vector.broadcast %17 : vector<22x1xf32> to vector<22x128xf32>
    %19 = arith.mulf %14, %18 : vector<22x128xf32>
    %20 = arith.truncf %19 : vector<22x128xf32> to vector<22x128xbf16>
    %c0_7 = arith.constant 0 : index
    %c0_8 = arith.constant 0 : index
    %21 = vector.load %arg3[%c0_7, %c0_8] : memref<128x128xbf16, #tpu.memory_space<vmem>>, vector<128x128xbf16>
    %cst_9 = arith.constant dense<0.000000e+00> : vector<22x128xf32>
    %22 = tpu.matmul %20, %21, %cst_9 {dimension_numbers = #tpu.dot_dimension_numbers<[1], [0], [0], [1], [0, 0, 1, 1], [], []>} : vector<22x128xbf16>, vector<128x128xbf16>, vector<22x128xf32> -> vector<22x128xf32>
    %c0_10 = arith.constant 0 : index
    %c0_11 = arith.constant 0 : index
    %23 = vector.load %arg4[%c0_10, %c0_11] : memref<1x128xf32, #tpu.memory_space<vmem>>, vector<1x128xf32>
    %24 = vector.shape_cast %23 : vector<1x128xf32> to vector<128xf32>
    %25 = vector.shape_cast %24 : vector<128xf32> to vector<1x128xf32>
    %26 = vector.broadcast %25 : vector<1x128xf32> to vector<22x128xf32>
    %27 = arith.addf %22, %26 : vector<22x128xf32>
    %c0_12 = arith.constant 0 : index
    %c0_13 = arith.constant 0 : index
    %28 = vector.load %arg5[%c0_12, %c0_13] : memref<128x128xbf16, #tpu.memory_space<vmem>>, vector<128x128xbf16>
    %cst_14 = arith.constant dense<0.000000e+00> : vector<22x128xf32>
    %29 = tpu.matmul %20, %28, %cst_14 {dimension_numbers = #tpu.dot_dimension_numbers<[1], [0], [0], [1], [0, 0, 1, 1], [], []>} : vector<22x128xbf16>, vector<128x128xbf16>, vector<22x128xf32> -> vector<22x128xf32>
    %c0_15 = arith.constant 0 : index
    %c0_16 = arith.constant 0 : index
    %30 = vector.load %arg6[%c0_15, %c0_16] : memref<1x128xf32, #tpu.memory_space<vmem>>, vector<1x128xf32>
    %31 = vector.shape_cast %30 : vector<1x128xf32> to vector<128xf32>
    %32 = vector.shape_cast %31 : vector<128xf32> to vector<1x128xf32>
    %33 = vector.broadcast %32 : vector<1x128xf32> to vector<22x128xf32>
    %34 = arith.addf %29, %33 : vector<22x128xf32>
    %35 = arith.negf %34 : vector<22x128xf32>
    %36 = math.exp %35 : vector<22x128xf32>
    %cst_17 = arith.constant 1.000000e+00 : f32
    %37 = vector.broadcast %cst_17 : f32 to vector<22x128xf32>
    %38 = arith.addf %37, %36 : vector<22x128xf32>
    %39 = arith.divf %37, %38 : vector<22x128xf32>
    %40 = arith.mulf %27, %39 : vector<22x128xf32>
    %41 = tpu.iota {dimensions = array<i32: 0>} : vector<22x128xi32>
    %c16_i32 = arith.constant 16 : i32
    %42 = arith.muli %arg1, %c16_i32 : i32
    %43 = vector.broadcast %42 : i32 to vector<22x128xi32>
    %44 = arith.addi %43, %41 : vector<22x128xi32>
    %c3_i32 = arith.constant 3 : i32
    %45 = vector.broadcast %c3_i32 : i32 to vector<22x128xi32>
    %46 = arith.subi %44, %45 : vector<22x128xi32>
    %c0_i32 = arith.constant 0 : i32
    %47 = vector.broadcast %c0_i32 : i32 to vector<22x128xi32>
    %48 = arith.cmpi sge, %46, %47 : vector<22x128xi32>
    %c64_i32 = arith.constant 64 : i32
    %49 = vector.broadcast %c64_i32 : i32 to vector<22x128xi32>
    %50 = arith.cmpi slt, %46, %49 : vector<22x128xi32>
    %51 = arith.andi %48, %50 : vector<22x128xi1>
    %cst_18 = arith.constant 0.000000e+00 : f32
    %52 = vector.broadcast %cst_18 : f32 to vector<22x128xf32>
    %53 = arith.select %51, %40, %52 : vector<22x128xi1>, vector<22x128xf32>
    %c0_19 = arith.constant 0 : index
    %c0_20 = arith.constant 0 : index
    %54 = vector.load %arg7[%c0_19, %c0_20] : memref<7x128xf32, #tpu.memory_space<vmem>>, vector<7x128xf32>
    %cst_21 = arith.constant 0.000000e+00 : f32
    %55 = vector.broadcast %cst_21 : f32 to vector<16x128xf32>
    %56 = vector.extract_strided_slice %53 {offsets = [0, 0], sizes = [16, 128], strides = [1, 1]} : vector<22x128xf32> to vector<16x128xf32>
    %57 = vector.extract_strided_slice %54 {offsets = [0, 0], sizes = [1, 128], strides = [1, 1]} : vector<7x128xf32> to vector<1x128xf32>
    %58 = vector.shape_cast %57 : vector<1x128xf32> to vector<128xf32>
    %59 = vector.shape_cast %58 : vector<128xf32> to vector<1x128xf32>
    %60 = vector.broadcast %59 : vector<1x128xf32> to vector<16x128xf32>
    %61 = arith.mulf %56, %60 : vector<16x128xf32>
    %62 = arith.addf %55, %61 : vector<16x128xf32>
    %63 = vector.extract_strided_slice %53 {offsets = [1, 0], sizes = [16, 128], strides = [1, 1]} : vector<22x128xf32> to vector<16x128xf32>
    %64 = vector.extract_strided_slice %54 {offsets = [1, 0], sizes = [1, 128], strides = [1, 1]} : vector<7x128xf32> to vector<1x128xf32>
    %65 = vector.shape_cast %64 : vector<1x128xf32> to vector<128xf32>
    %66 = vector.shape_cast %65 : vector<128xf32> to vector<1x128xf32>
    %67 = vector.broadcast %66 : vector<1x128xf32> to vector<16x128xf32>
    %68 = arith.mulf %63, %67 : vector<16x128xf32>
    %69 = arith.addf %62, %68 : vector<16x128xf32>
    %70 = vector.extract_strided_slice %53 {offsets = [2, 0], sizes = [16, 128], strides = [1, 1]} : vector<22x128xf32> to vector<16x128xf32>
    %71 = vector.extract_strided_slice %54 {offsets = [2, 0], sizes = [1, 128], strides = [1, 1]} : vector<7x128xf32> to vector<1x128xf32>
    %72 = vector.shape_cast %71 : vector<1x128xf32> to vector<128xf32>
    %73 = vector.shape_cast %72 : vector<128xf32> to vector<1x128xf32>
    %74 = vector.broadcast %73 : vector<1x128xf32> to vector<16x128xf32>
    %75 = arith.mulf %70, %74 : vector<16x128xf32>
    %76 = arith.addf %69, %75 : vector<16x128xf32>
    %77 = vector.extract_strided_slice %53 {offsets = [3, 0], sizes = [16, 128], strides = [1, 1]} : vector<22x128xf32> to vector<16x128xf32>
    %78 = vector.extract_strided_slice %54 {offsets = [3, 0], sizes = [1, 128], strides = [1, 1]} : vector<7x128xf32> to vector<1x128xf32>
    %79 = vector.shape_cast %78 : vector<1x128xf32> to vector<128xf32>
    %80 = vector.shape_cast %79 : vector<128xf32> to vector<1x128xf32>
    %81 = vector.broadcast %80 : vector<1x128xf32> to vector<16x128xf32>
    %82 = arith.mulf %77, %81 : vector<16x128xf32>
    %83 = arith.addf %76, %82 : vector<16x128xf32>
    %84 = vector.extract_strided_slice %53 {offsets = [4, 0], sizes = [16, 128], strides = [1, 1]} : vector<22x128xf32> to vector<16x128xf32>
    %85 = vector.extract_strided_slice %54 {offsets = [4, 0], sizes = [1, 128], strides = [1, 1]} : vector<7x128xf32> to vector<1x128xf32>
    %86 = vector.shape_cast %85 : vector<1x128xf32> to vector<128xf32>
    %87 = vector.shape_cast %86 : vector<128xf32> to vector<1x128xf32>
    %88 = vector.broadcast %87 : vector<1x128xf32> to vector<16x128xf32>
    %89 = arith.mulf %84, %88 : vector<16x128xf32>
    %90 = arith.addf %83, %89 : vector<16x128xf32>
    %91 = vector.extract_strided_slice %53 {offsets = [5, 0], sizes = [16, 128], strides = [1, 1]} : vector<22x128xf32> to vector<16x128xf32>
    %92 = vector.extract_strided_slice %54 {offsets = [5, 0], sizes = [1, 128], strides = [1, 1]} : vector<7x128xf32> to vector<1x128xf32>
    %93 = vector.shape_cast %92 : vector<1x128xf32> to vector<128xf32>
    %94 = vector.shape_cast %93 : vector<128xf32> to vector<1x128xf32>
    %95 = vector.broadcast %94 : vector<1x128xf32> to vector<16x128xf32>
    %96 = arith.mulf %91, %95 : vector<16x128xf32>
    %97 = arith.addf %90, %96 : vector<16x128xf32>
    %98 = vector.extract_strided_slice %53 {offsets = [6, 0], sizes = [16, 128], strides = [1, 1]} : vector<22x128xf32> to vector<16x128xf32>
    %99 = vector.extract_strided_slice %54 {offsets = [6, 0], sizes = [1, 128], strides = [1, 1]} : vector<7x128xf32> to vector<1x128xf32>
    %100 = vector.shape_cast %99 : vector<1x128xf32> to vector<128xf32>
    %101 = vector.shape_cast %100 : vector<128xf32> to vector<1x128xf32>
    %102 = vector.broadcast %101 : vector<1x128xf32> to vector<16x128xf32>
    %103 = arith.mulf %98, %102 : vector<16x128xf32>
    %104 = arith.addf %97, %103 : vector<16x128xf32>
    %c0_22 = arith.constant 0 : index
    %c0_23 = arith.constant 0 : index
    %105 = vector.load %arg8[%c0_22, %c0_23] : memref<1x128xf32, #tpu.memory_space<vmem>>, vector<1x128xf32>
    %106 = vector.shape_cast %105 : vector<1x128xf32> to vector<128xf32>
    %107 = vector.shape_cast %106 : vector<128xf32> to vector<1x128xf32>
    %108 = vector.broadcast %107 : vector<1x128xf32> to vector<16x128xf32>
    %109 = arith.addf %104, %108 : vector<16x128xf32>
    %110 = arith.negf %109 : vector<16x128xf32>
    %111 = math.exp %110 : vector<16x128xf32>
    %cst_24 = arith.constant 1.000000e+00 : f32
    %112 = vector.broadcast %cst_24 : f32 to vector<16x128xf32>
    %113 = arith.addf %112, %111 : vector<16x128xf32>
    %114 = arith.divf %112, %113 : vector<16x128xf32>
    %115 = arith.mulf %109, %114 : vector<16x128xf32>
    %116 = arith.truncf %115 : vector<16x128xf32> to vector<16x128xbf16>
    %c0_25 = arith.constant 0 : index
    %c0_26 = arith.constant 0 : index
    %117 = vector.load %arg9[%c0_25, %c0_26] : memref<128x128xbf16, #tpu.memory_space<vmem>>, vector<128x128xbf16>
    %cst_27 = arith.constant dense<0.000000e+00> : vector<16x128xf32>
    %118 = tpu.matmul %116, %117, %cst_27 {dimension_numbers = #tpu.dot_dimension_numbers<[1], [0], [0], [1], [0, 0, 1, 1], [], []>} : vector<16x128xbf16>, vector<128x128xbf16>, vector<16x128xf32> -> vector<16x128xf32>
    %c0_28 = arith.constant 0 : index
    %c0_29 = arith.constant 0 : index
    %119 = vector.load %arg10[%c0_28, %c0_29] : memref<1x128xf32, #tpu.memory_space<vmem>>, vector<1x128xf32>
    %120 = vector.shape_cast %119 : vector<1x128xf32> to vector<128xf32>
    %121 = vector.shape_cast %120 : vector<128xf32> to vector<1x128xf32>
    %122 = vector.broadcast %121 : vector<1x128xf32> to vector<16x128xf32>
    %123 = arith.addf %118, %122 : vector<16x128xf32>
    %c0_30 = arith.constant 0 : index
    %c0_31 = arith.constant 0 : index
    %c0_32 = arith.constant 0 : index
    %124 = vector.load %arg11[%c0_30, %c0_31, %c0_32] : memref<1x16x128xf32, #tpu.memory_space<vmem>>, vector<1x16x128xf32>
    %125 = vector.shape_cast %124 : vector<1x16x128xf32> to vector<16x128xf32>
    %126 = vector.shape_cast %123 : vector<16x128xf32> to vector<1x16x128xf32>
    tpu.vector_store %arg11[%c0_30, %c0_31, %c0_32], %126 {strides = array<i32>} : memref<1x16x128xf32, #tpu.memory_space<vmem>>, vector<1x16x128xf32>,
    return
  }
  func.func @transform_0(%arg0: i32, %arg1: i32) -> (i32, i32, i32, i32) {
    %c0_i32 = arith.constant 0 : i32
    %c0_i32_0 = arith.constant 0 : i32
    %c0_i32_1 = arith.constant 0 : i32
    return %arg0, %arg1, %c0_i32, %c0_i32_0 : i32, i32, i32, i32
  }
  func.func @transform_1(%arg0: i32, %arg1: i32) -> (i32, i32) {
    %c0_i32 = arith.constant 0 : i32
    %c0_i32_0 = arith.constant 0 : i32
    %c0_i32_1 = arith.constant 0 : i32
    return %c0_i32, %c0_i32_0 : i32, i32
  }
  func.func @transform_2(%arg0: i32, %arg1: i32) -> (i32, i32) {
    %c0_i32 = arith.constant 0 : i32
    %c0_i32_0 = arith.constant 0 : i32
    %c0_i32_1 = arith.constant 0 : i32
    return %c0_i32, %c0_i32_0 : i32, i32
  }
  func.func @transform_3(%arg0: i32, %arg1: i32) -> (i32, i32) {
    %c0_i32 = arith.constant 0 : i32
    %c0_i32_0 = arith.constant 0 : i32
    %c0_i32_1 = arith.constant 0 : i32
    return %c0_i32, %c0_i32_0 : i32, i32
  }
  func.func @transform_4(%arg0: i32, %arg1: i32) -> (i32, i32) {
    %c0_i32 = arith.constant 0 : i32
    %c0_i32_0 = arith.constant 0 : i32
    %c0_i32_1 = arith.constant 0 : i32
    return %c0_i32, %c0_i32_0 : i32, i32
  }
  func.func @transform_5(%arg0: i32, %arg1: i32) -> (i32, i32) {
    %c0_i32 = arith.constant 0 : i32
    %c0_i32_0 = arith.constant 0 : i32
    %c0_i32_1 = arith.constant 0 : i32
    return %c0_i32, %c0_i32_0 : i32, i32
  }
  func.func @transform_6(%arg0: i32, %arg1: i32) -> (i32, i32) {
    %c0_i32 = arith.constant 0 : i32
    %c0_i32_0 = arith.constant 0 : i32
    %c0_i32_1 = arith.constant 0 : i32
    return %c0_i32, %c0_i32_0 : i32, i32
  }
  func.func @transform_7(%arg0: i32, %arg1: i32) -> (i32, i32) {
    %c0_i32 = arith.constant 0 : i32
    %c0_i32_0 = arith.constant 0 : i32
    %c0_i32_1 = arith.constant 0 : i32
    return %c0_i32, %c0_i32_0 : i32, i32
  }
  func.func @transform_8(%arg0: i32, %arg1: i32) -> (i32, i32) {
    %c0_i32 = arith.constant 0 : i32
    %c0_i32_0 = arith.constant 0 : i32
    %c0_i32_1 = arith.constant 0 : i32
    return %c0_i32, %c0_i32_0 : i32, i32
  }
  func.func @transform_9(%arg0: i32, %arg1: i32) -> (i32, i32, i32) {
    %c0_i32 = arith.constant 0 : i32
    %c0_i32_0 = arith.constant 0 : i32
    return %arg0, %arg1, %c0_i32 : i32, i32, i32
  }
}

</mosaic_0001>

<bundles_post_ra>
// kernel: tpu_custom_call.1
= control target key start
LH: loop header
LB: loop body
LE: loop exit
PB: predicated region body
PF: predicated region fallthrough
CT: control target
= control target key end

     0   :  { %s1760_s0 = inlined_call_operand.vmem [shape: f32[2,4,22,128], index: 0, kind: input, shape index: {}]   ;;  %s1761_s1 = inlined_call_operand.vmem [shape: bf16[128,128], index: 1, kind: input, shape index: {}]   ;;  %s1762_s2 = inlined_call_operand.vmem [shape: f32[1,128], index: 2, kind: input, shape index: {}]   ;;  %s1763_s3 = inlined_call_operand.vmem [shape: bf16[128,128], index: 3, kind: input, shape index: {}]   ;;  %s1764_s4 = inlined_call_operand.vmem [shape: f32[1,128], index: 4, kind: input, shape index: {}]   ;;  %s1765_s5 = inlined_call_operand.vmem [shape: f32[7,128], index: 5, kind: input, shape index: {}]   ;;  %s1766_s6 = inlined_call_operand.vmem [shape: f32[1,128], index: 6, kind: input, shape index: {}]   ;;  %s1767_s7 = inlined_call_operand.vmem [shape: bf16[128,128], index: 7, kind: input, shape index: {}]   ;;  %s1768_s8 = inlined_call_operand.vmem [shape: f32[1,128], index: 8, kind: input, shape index: {}]   ;;  %s1769_s9 = inlined_call_operand.hbm [shape: f32[2,64,128], index: 9, kind: output, shape index: {}]  }
   0x1   :  { %1773 = sst [smem:[#allocation8_spill]] %s1760_s0 }
   0x2   :  { %1774 = sst [smem:[#allocation9_spill]] %s1761_s1 }
   0x3   :  { %1775 = sst [smem:[#allocation10_spill]] %s1762_s2 }
   0x4   :  { %14 = vsyncpa [#allocation3], 0 }
   0x5   :  { %16 = vsyncpa [#allocation3 + $0x1], 0  ;;  %s1439_s30 = smov 0   ;;  %s1441_s10 = smov 0  }
   0x6   :  { %s1443_s11 = smov 0   ;;  %s1445_s12 = smov 0  }
   0x7   :  { %s1447_s13 = smov 0   ;;  %s1449_s14 = smov 0  }
   0x8   :  { %s1451_s15 = smov 0   ;;  %s1453_s16 = smov 0  }
   0x9 LB: > { %1776 = sst [smem:[#allocation5_spill]] %s1376_s14  ;;  %s1032_s17 = sadd.s32 4294967295, %s1384_s16   ;;  %s1384_s16 = sphi %s1453_s16, %s22_s16   ;;  %s1380_s15 = sphi %s1451_s15, %s1793_s15   ;;  %s1376_s14 = sphi %s1449_s14, %s1787_s14   ;;  %s1372_s13 = sphi %s1447_s13, %s1792_s13   ;;  %s1368_s12 = sphi %s1445_s12, %s1786_s12   ;;  %s1364_s11 = sphi %s1443_s11, %s1791_s11   ;;  %s1360_s10 = sphi %s1441_s10, %s1790_s10   ;;  %s1356_s30 = sphi %s1439_s30, %s1789_s30  }
   0xa   : > { %s1033_s18 = sadd.s32 4294967294, %s1384_s16   ;;  %s31_s19 = sadd.s32 1, %s1376_s14 }
   0xb   : > { %p32_p0 = scmp.ge.s32.totalorder %s31_s19, 4  ;;  %s34_s20 = sadd.s32 1, %s1380_s15 }
   0xc   : > { %p249_p1 = scmp.ne.s32.totalorder %s1364_s11, %s1360_s10  ;;  %p250_p2 = scmp.eq.s32.totalorder %s1032_s17, 7 }
   0xd   : > { %s1795_s19 = smov (%p32_p0, %s31_s19), 0  ;;  %s1797_s20 = smov (!%p32_p0, %s34_s20), %s1380_s15 }
   0xe   : > { %1777 = sst [smem:[#allocation6_spill]] %s1795_s19  ;;  %s235_s21 = ssub.s32 %s1376_s14, %s1795_s19 }
   0xf   : > { %p1490_p3 = por %p250_p2, %p249_p1  ;;  %p36_p4 = scmp.ge.s32.totalorder %s1797_s20, 2 }
  0x10   : > { %p255_p5 = scmp.ne.s32.totalorder %s1360_s10, %s1356_s30  ;;  %p256_p6 = scmp.eq.s32.totalorder %s1033_s18, 7 }
  0x11   : > { %p1036_p7 = scmp.ge.s32.totalorder %s1384_s16, 1  ;;  %s1799_s20 = smov (%p36_p4, %s1797_s20), 0 }
  0x12   : > { %1779 = sst [smem:[#allocation7_spill]] %s1799_s20  ;;  %p1499_p8 = por %p256_p6, %p255_p5 }
  0x13   : > { %p310_p9 = scmp.lt.s32.totalorder %s1384_s16, 9  ;;  %s234_s24 = ssub.s32 %s1380_s15, %s1799_s20 }
  0x14   : > { %s239_s25 = sadd.s32 1, %s1364_s11  ;;  %s236_s26 = sor.u32 %s235_s21, %s234_s24 }
  0x15   : > { %p311_p10 = pnand %p1036_p7, %p310_p9  ;;  %p237_p11 = scmp.eq.s32.totalorder %s236_s26, 0 }
  0x16   : > { %p350_p12 = scmp.lt.s32.totalorder (!%p311_p10), %s1372_s13, 1  ;;  %p352_p13 = scmp.lt.s32.totalorder (!%p311_p10), %s1368_s12, 3 }
  0x17   : > { %s1508_s27 = scalar_select %p237_p11, %s1364_s11, %s239_s25  }
  0x18   : > { %314 = sbr.rel (%p311_p10) target bundleno = 682 (0x2aa), region = 56  ;;  %s1781_s0 = sld [smem:[#allocation8_spill]] (!%p311_p10) }
  0x19   : > { %s1782_s1 = sld [smem:[#allocation9_spill]] (!%p311_p10)  ;;  %s347_s20 = sand.u32 (!%p311_p10), 1, %s1360_s10  }
  0x1a   : > { %s1783_s2 = sld [smem:[#allocation10_spill]] (!%p311_p10)  ;;  %s1145_s25 = sshll.u32 (!%p311_p10), %s1368_s12, 1 }
  0x1b   : > { %s1146_s26 = sshll.u32 (!%p311_p10), %s1372_s13, 3 }
  0x1d   : > { %s351_s28 = scalar_select %p350_p12, %s1372_s13, 1  ;;  %vm367_vm0 = vcmask 1045504   ;;  %v1386_v4 = vmov 128.0   ;;  %v1165_v25 = vld [vmem:[%s1763_s3 + $0x38] sm:$0xff]  ;;  %v1164_v27 = vld [vmem:[%s1763_s3 + $0x30] sm:$0xff]  ;;  %v1163_v29 = vld [vmem:[%s1763_s3 + $0x28] sm:$0xff] }
  0x1e   : > { %s353_s29 = scalar_select %p352_p13, %s1368_s12, 3  ;;  %1262 = vrcp.f32 %v1386_v4  ;;  %589 = vmatpush.bf16.msra.mxu1 %v1165_v25  ;;  %v1162_v31 = vld [vmem:[%s1763_s3 + $0x20] sm:$0xff]  ;;  %v1161_v33 = vld [vmem:[%s1763_s3 + $0x18] sm:$0xff]  ;;  %v1160_v35 = vld [vmem:[%s1763_s3 + $0x10] sm:$0xff] }
  0x1f   : > { %s1183_s17 = smul.u32 12, %s351_s28  ;;  %v1157_v24 = vld [vmem:[%s1782_s1 + $0x38] sm:$0xff]  ;;  %v1156_v26 = vld [vmem:[%s1782_s1 + $0x30] sm:$0xff]  ;;  %v1155_v28 = vld [vmem:[%s1782_s1 + $0x28] sm:$0xff]  ;;  %s1037_s28 = sshll.u32 %s347_s20, 4 }
  0x20   : > { %s1182_s18 = smul.u32 3, %s353_s29  ;;  %503 = vmatpush.bf16.msra.mxu0 %v1157_v24  ;;  %1174 = vmatpush.bf16.msra.mxu3 %v1157_v24  ;;  %v1154_v30 = vld [vmem:[%s1782_s1 + $0x20] sm:$0xff]  ;;  %v1153_v32 = vld [vmem:[%s1782_s1 + $0x18] sm:$0xff]  ;;  %v1152_v34 = vld [vmem:[%s1782_s1 + $0x10] sm:$0xff]  ;;  %s1310_s29 = scalar_lea.hbm %s1769_s9, 128 }
  0x21   : > { %v1151_v36 = vld [vmem:[%s1782_s1 + $0x8] sm:$0xff]  ;;  %v1150_v38 = vld [vmem:[%s1782_s1] sm:$0xff]  ;;  %v1173_v24 = vld [vmem:[%s1767_s7 + $0x38] sm:$0xff] }
  0x22   : > { %s356_s19 = sadd.s32 %s1183_s17, %s1182_s18  ;;  %590 = vmatpush.bf16.msra.mxu1 %v1164_v27  ;;  %v1159_v37 = vld [vmem:[%s1763_s3 + $0x8] sm:$0xff]  ;;  %v1158_v39 = vld [vmem:[%s1763_s3] sm:$0xff]  ;;  %913 = vmatpush.bf16.msra.mxu2 %v1173_v24  ;;  %s941_s18 = sadd.s32 %s1146_s26, %s1145_s25 }
  0x23   : > { %s1038_s14 = sshll.u32 %s356_s19, 3  ;;  %s1106_s19 = sshll.u32 %s1368_s12, 4 }
  0x24   : > { %s358_s24 = scalar_lea.vmem %s1781_s0, %s1038_s14  ;;  %v1263_v5 = vpop.eup %1262  ;;  %504 = vmatpush.bf16.msra.mxu0 %v1156_v26  ;;  %1175 = vmatpush.bf16.msra.mxu3 %v1156_v26  ;;  %v672_v27 = vstv %s1106_s19  ;;  %s1147_s21 = sshll.u32 %s941_s18, 3 }
  0x25   : > { %v360_v0 = vld [vmem:[%s358_s24] sm:$0xff]  ;;  %v362_v1 = vld [vmem:[%s358_s24 + $0x10] sm:$0x3f]  ;;  %v361_v3 = vld [vmem:[%s358_s24 + $0x8] sm:$0xff]  ;;  %v372_v6 = vmul.f32 128.0, %v1263_v5  ;;  %vm376_vm1 = vweird.f32 %v1263_v5  ;;  %s349_s24 = scalar_lea.vmem [#allocation2], %s1037_s28  ;;  %s943_s0 = scalar_lea.hbm %s1769_s9, %s1147_s21 }
  0x26   : > { %363 = vadd.xlane.f32.xlu0 %v360_v0  ;;  %v368_v2 = vsel %vm367_vm0, %v362_v1, 0.0  ;;  %591 = vmatpush.bf16.msra.mxu1 %v1163_v29  ;;  %v1172_v29 = vld [vmem:[%s1767_s7 + $0x30] sm:$0xff]  ;;  %s944_s1 = sshll.u32 %s349_s24, 4  ;;  %s930_s12 = scalar_lea.sflag [#allocation3], %s347_s20  ;;  %s945_s1 = int_to_ptr.vmem [resolvable:$true] %s944_s1 }
  0x27   : > { %369 = vadd.xlane.f32.xlu1 %v368_v2  ;;  %v373_v7 = vsub.f32 1.0, %v372_v6  ;;  %914 = vmatpush.bf16.msra.mxu2 %v1172_v29 }
  0x28   : > { %505 = vmatpush.bf16.msra.mxu0 %v1155_v28  ;;  %1176 = vmatpush.bf16.msra.mxu3 %v1155_v28 }
  0x29   : > { %v374_v8 = vmul.f32 %v1263_v5, %v373_v7 }
  0x2a   : > { %592 = vmatpush.bf16.msra.mxu1 %v1162_v31 }
  0x2b   : > { %v375_v9 = vadd.f32 %v1263_v5, %v374_v8 }
  0x2c   : > { %506 = vmatpush.bf16.msra.mxu0 %v1154_v30  ;;  %1177 = vmatpush.bf16.msra.mxu3 %v1154_v30 }
  0x2d   : > { %v1518_v10 = vsel %vm376_vm1, %v1263_v5, %v375_v9 }
  0x2e   : > { %365 = vadd.xlane.f32.xlu0 %v361_v3  ;;  %593 = vmatpush.bf16.msra.mxu1 %v1161_v33 }
  0x30   : > { %507 = vmatpush.bf16.msra.mxu0 %v1153_v32  ;;  %1178 = vmatpush.bf16.msra.mxu3 %v1153_v32 }
  0x32   : > { %594 = vmatpush.bf16.msra.mxu1 %v1160_v35 }
  0x34   : > { %508 = vmatpush.bf16.msra.mxu0 %v1152_v34  ;;  %1179 = vmatpush.bf16.msra.mxu3 %v1152_v34 }
  0x36   : > { %595 = vmatpush.bf16.msra.mxu1 %v1159_v37 }
  0x38   : > { %509 = vmatpush.bf16.msra.mxu0 %v1151_v36  ;;  %1180 = vmatpush.bf16.msra.mxu3 %v1151_v36 }
  0x3a   : > { %596 = vmatpush.bf16.msra.mxu1 %v1158_v39 }
  0x3c   : > { %510 = vmatpush.bf16.msra.mxu0 %v1150_v38  ;;  %1181 = vmatpush.bf16.msra.mxu3 %v1150_v38  ;;  %v1171_v38 = vld [vmem:[%s1767_s7 + $0x28] sm:$0xff] }
  0x3d   : > { %915 = vmatpush.bf16.msra.mxu2 %v1171_v38 }
  0x99   : > { %v364_v11 = vpop.xlane.xlu0 %363 }
  0x9a   : > { %v378_v12 = vmul.f32 %v1518_v10, %v364_v11  ;;  %v370_v15 = vpop.xlane.xlu1 %369  ;;  %v1259_v11 = vld [vmem:[%s1764_s4] ss:$0 sm:$0xff] }
  0x9b   : > { %v380_v17 = vmul.f32 %v1518_v10, %v370_v15 }
  0x9c   : > { %v1521_v13 = vsub.f32 %v360_v0, %v378_v12 }
  0x9d   : > { %v1529_v20 = vsub.f32 %v362_v1, %v380_v17 }
  0x9e   : > { %v384_v14 = vmul.f32 %v1521_v13, %v1521_v13 }
  0x9f   : > { %v386_v22 = vmul.f32 %v1529_v20, %v1529_v20 }
  0xa0   : > { %387 = vadd.xlane.f32.xlu1 %v384_v14 }
  0xa1   : > { %v366_v16 = vpop.xlane.xlu0 %365  ;;  %v391_v23 = vsel %vm367_vm0, %v386_v22, 0.0 }
  0xa2   : > { %v379_v18 = vmul.f32 %v1518_v10, %v366_v16 }
  0xa4   : > { %v1527_v19 = vsub.f32 %v361_v3, %v379_v18 }
  0xa6   : > { %v385_v21 = vmul.f32 %v1527_v19, %v1527_v19 }
  0xa8   : > { %389 = vadd.xlane.f32.xlu2 %v385_v21 }
  0xb0   : > { %392 = vadd.xlane.f32.xlu2 %v391_v23 }
 0x113   : > { %v388_v40 = vpop.xlane.xlu1 %387 }
 0x114   : > { %v394_v41 = vmul.f32 %v388_v40, %v1518_v10 }
 0x116   : > { %v397_v42 = vadd.f32 1e-05, %v394_v41 }
 0x118   : > { %1264 = vrsqrt.f32 %v397_v42  ;;  %vm406_vm3 = vweird.f32 %v397_v42 }
 0x11b   : > { %v390_v43 = vpop.xlane.xlu2 %389 }
 0x11c   : > { %v395_v44 = vmul.f32 %v390_v43, %v1518_v10 }
 0x11e   : > { %v1265_v45 = vpop.eup %1264  ;;  %v398_v46 = vadd.f32 1e-05, %v395_v44 }
 0x11f   : > { %v401_v47 = vmul.f32 %v1265_v45, %v397_v42  ;;  %vm407_vm2 = vweird.f32 %v1265_v45 }
 0x120   : > { %1266 = vrsqrt.f32 %v398_v46  ;;  %vm408_vm5 = vmor %vm406_vm3, %vm407_vm2  ;;  %vm416_vm6 = vweird.f32 %v398_v46 }
 0x121   : > { %v402_v48 = vmul.f32 %v1265_v45, %v401_v47 }
 0x123   : > { %v403_v49 = vmul.f32 0.5, %v402_v48  ;;  %v393_v50 = vpop.xlane.xlu2 %392  ;;  %v1170_v48 = vld [vmem:[%s1767_s7 + $0x20] sm:$0xff] }
 0x124   : > { %v396_v51 = vmul.f32 %v393_v50, %v1518_v10  ;;  %916 = vmatpush.bf16.msra.mxu2 %v1170_v48 }
 0x125   : > { %v404_v54 = vsub.f32 1.5, %v403_v49 }
 0x126   : > { %v1267_v52 = vpop.eup %1266  ;;  %v399_v53 = vadd.f32 1e-05, %v396_v51 }
 0x127   : > { %v411_v55 = vmul.f32 %v1267_v52, %v398_v46  ;;  %v405_v58 = vmul.f32 %v1265_v45, %v404_v54  ;;  %vm417_vm4 = vweird.f32 %v1267_v52 }
 0x128   : > { %1268 = vrsqrt.f32 %v399_v53  ;;  %vm418_vm7 = vmor %vm416_vm6, %vm417_vm4  ;;  %vm426_vm8 = vweird.f32 %v399_v53 }
 0x129   : > { %v412_v56 = vmul.f32 %v1267_v52, %v411_v55  ;;  %v409_v62 = vsel %vm408_vm5, %v1265_v45, %v405_v58  ;;  %v1258_v45 = vld [vmem:[%s1783_s2] ss:$0 sm:$0xff]  ;;  %s946_s2 = sshll.u32 %s943_s0, 4  ;;  %s947_s2 = int_to_ptr.hbm [resolvable:$true] %s946_s2 }
 0x12a   : > { %v430_v2 = vmul.f32 %v409_v62, %v1521_v13  ;;  %v1620_v55 = vld [vmem:[%s1765_s5] sm:$0x7f]  ;;  %s1304_s13 = sshra.s32 %s947_s2, 4  ;;  %s1305_s13 = int_to_ptr.hbm [resolvable:$true] %s1304_s13 }
 0x12b   : > { %v413_v57 = vmul.f32 0.5, %v412_v56  ;;  %s1306_s25 = scalar_lea.hbm %s1305_s13, 16  ;;  %p1311_p4 = scmp.lt.s32.totalorder %s1305_s13, %s1769_s9 }
 0x12c   : > { %p1307_p0 = scmp.ne.s32.totalorder %s1305_s13, %s1306_s25  ;;  %p1312_p5 = scmp.lt.s32.totalorder %s1310_s29, %s1306_s25 }
 0x12d   : > { %v414_v59 = vsub.f32 1.5, %v413_v57 }
 0x12e   : > { %v1269_v60 = vpop.eup %1268  ;;  %p1308_p1 = pnand %p1307_p0, %p1490_p3  ;;  %p1313_p6 = por %p1312_p5, %p1311_p4 }
 0x12f   : > { %v421_v61 = vmul.f32 %v1269_v60, %v399_v53  ;;  %v415_v63 = vmul.f32 %v1267_v52, %v414_v59  ;;  %vm427_vm9 = vweird.f32 %v1269_v60 }
 0x130   : > { %vm428_vm10 = vmor %vm426_vm8, %vm427_vm9  ;;  %p1309_p2 = pneg %p1308_p1 }
 0x131   : > { %v422_v0 = vmul.f32 %v1269_v60, %v421_v61  ;;  %v419_v1 = vsel %vm418_vm7, %v1267_v52, %v415_v63  ;;  %v692_v63 = vperm.slane %v1620_v55, 0 }
 0x132   : > { %v431_v3 = vmul.f32 %v419_v1, %v1527_v19  ;;  %p1314_p7 = pnand %p1313_p6, %p1309_p2 }
 0x133   : > { %v423_v4 = vmul.f32 0.5, %v422_v0 }
 0x134   : > { %v433_v5 = vpack.c.bf16 %v431_v3, %v430_v2 }
 0x135   : > { %v424_v6 = vsub.f32 1.5, %v423_v4 }
 0x136   : > { %511 = vmatmul.bf16.vlgmr.msra.gmra.mxu0 %v433_v5  ;;  %597 = vmatmul.bf16.vlgmr.msra.gmra.mxu1 %v433_v5  ;;  %v1635_v5 = vperm.slane %v1620_v55, 1 }
 0x137   : > { %v425_v7 = vmul.f32 %v1269_v60, %v424_v6  ;;  %v1638_v6 = vperm.slane %v1620_v55, 2 }
 0x139   : > { %v429_v8 = vsel %vm428_vm10, %v1269_v60, %v425_v7  ;;  %v1169_v60 = vld [vmem:[%s1767_s7 + $0x18] sm:$0xff]  ;;  %v1641_v7 = vperm.slane %v1620_v55, 3  ;;  %vm704_vm10 = vcmask 1046528  }
 0x13a   : > { %v432_v9 = vmul.f32 %v429_v8, %v1529_v20  ;;  %v667_v20 = vlaneseq  ;;  %v1644_v8 = vperm.slane %v1620_v55, 4  ;;  %917 = vmatpush.bf16.msra.mxu2 %v1169_v60 }
 0x13c   : > { %v434_v10 = vpack.c.bf16 %v432_v9, %v432_v9  ;;  %v668_v25 = vshrl.u32 %v667_v20, 7 }
 0x13e   : > { %516 = vmatmul.bf16.vlgmr.msra.gmra.mxu3 %v434_v10  ;;  %v673_v33 = vadd.s32 %v672_v27, %v668_v25  ;;  %v669_v37 = vadd.s32 8, %v668_v25  ;;  %v670_v52 = vadd.s32 16, %v668_v25 }
 0x140   : > { %v1107_v43 = vadd.s32 4294967293, %v673_v33  ;;  %v674_v47 = vadd.s32 %v672_v27, %v669_v37  ;;  %v675_v62 = vadd.s32 %v672_v27, %v670_v52  ;;  %v1167_v27 = vld [vmem:[%s1767_s7 + $0x8] sm:$0xff] }
 0x142   : > { %vm679_vm15 = vcmp.ge.s32.totalorder %v1107_v43, 0  ;;  %vm682_vm1 = vcmp.lt.s32.totalorder %v1107_v43, 64  ;;  %v1108_v59 = vadd.s32 4294967293, %v674_v47 }
 0x143   : > { %vm1630_vm3 = vmand %vm679_vm15, %vm682_vm1  ;;  %vm754_vm1 = vcmask 1043456  }
 0x144   : > { %vm680_vm5 = vcmp.ge.s32.totalorder %v1108_v59, 0  ;;  %vm683_vm6 = vcmp.lt.s32.totalorder %v1108_v59, 64 }
 0x145   : > { %vm686_vm9 = vmand %vm680_vm5, %vm683_vm6  ;;  %vm771_vm5 = vcmask 1042432   ;;  %vm788_vm6 = vcmask 1041408  }
 0x146   : > { %602 = vmatmul.bf16.gmra.mxu1 %v434_v10  ;;  %v1168_v10 = vld [vmem:[%s1767_s7 + $0x10] sm:$0xff] }
 0x147   : > { %918 = vmatpush.bf16.msra.mxu2 %v1168_v10 }
 0x14b   : > { %919 = vmatpush.bf16.msra.mxu2 %v1167_v27 }
 0x1b3   : > { %v598_v12 = vpop.f32.mrf.mxu1  ;;  %v512_v35 = vpop.f32.mrf.mxu0 }
 0x1b4   : > { %v599_v13 = vadd.f32 %v1259_v11, %v598_v12  ;;  %v513_v57 = vadd.f32 %v1258_v45, %v512_v35 }
 0x1b6   : > { %v1103_v14 = vmul.f32 -1.442695, %v599_v13 }
 0x1b8   : > { %1270 = vpow2.f32 %v1103_v14  ;;  %v1109_v14 = vadd.s32 4294967293, %v675_v62 }
 0x1bb   : > { %v600_v15 = vpop.f32.mrf.mxu1  ;;  %v514_v1 = vpop.f32.mrf.mxu0 }
 0x1bc   : > { %v601_v16 = vadd.f32 %v1259_v11, %v600_v15  ;;  %v515_v12 = vadd.f32 %v1258_v45, %v514_v1  ;;  %v1652_v15 = vperm.slane %v1620_v55, 5 }
 0x1be   : > { %v1271_v17 = vpop.eup %1270  ;;  %v1104_v18 = vmul.f32 -1.442695, %v601_v16 }
 0x1bf   : > { %v616_v19 = vadd.f32 1.0, %v1271_v17 }
 0x1c0   : > { %1272 = vpow2.f32 %v1104_v18 }
 0x1c1   : > { %1274 = vrcp.f32 %v616_v19  ;;  %v1593_v21 = vpop.f32.mrf.mxu3  ;;  %v630_v39 = vand.u32 2147483648, %v616_v19  ;;  %v628_v42 = vand.u32 2147483647, %v616_v19  ;;  %vm624_vm12 = vweird.f32 %v616_v19 }
 0x1c2   : > { %v518_v20 = vadd.f32 %v1258_v45, %v1593_v21 }
 0x1c3   : > { %v603_v22 = vpop.f32.mrf.mxu1  ;;  %v631_v50 = vor.u32 1.1754944e-38, %v630_v39  ;;  %vm629_vm14 = vcmp.eq.f32.partialorder %v628_v42, 8.507059e+37 }
 0x1c4   : > { %v604_v23 = vadd.f32 %v1259_v11, %v603_v22  ;;  %v1660_v22 = vperm.slane %v1620_v55, 6 }
 0x1c6   : > { %v1273_v26 = vpop.eup %1272  ;;  %v1105_v28 = vmul.f32 -1.442695, %v604_v23 }
 0x1c7   : > { %v1275_v30 = vpop.eup %1274  ;;  %v1602_v31 = vadd.f32 1.0, %v1273_v26 }
 0x1c8   : > { %v620_v32 = vmul.f32 %v1275_v30, %v616_v19  ;;  %1276 = vpow2.f32 %v1105_v28  ;;  %vm625_vm11 = vweird.f32 %v1275_v30 }
 0x1c9   : > { %1278 = vrcp.f32 %v1602_v31  ;;  %v519_v34 = vpop.f32.mrf.mxu3  ;;  %vm626_vm13 = vmor %vm624_vm12, %vm625_vm11  ;;  %v645_v61 = vand.u32 2147483648, %v1602_v31  ;;  %v643_v3 = vand.u32 2147483647, %v1602_v31  ;;  %vm639_vm4 = vweird.f32 %v1602_v31 }
 0x1ca   : > { %v621_v36 = vsub.f32 1.0, %v620_v32  ;;  %vm681_vm11 = vcmp.ge.s32.totalorder %v1109_v14, 0  ;;  %vm684_vm12 = vcmp.lt.s32.totalorder %v1109_v14, 64 }
 0x1cb   : > { %v605_v40 = vpop.f32.mrf.mxu1  ;;  %v646_v13 = vor.u32 1.1754944e-38, %v645_v61  ;;  %vm644_vm8 = vcmp.eq.f32.partialorder %v643_v3, 8.507059e+37 }
 0x1cc   : > { %v622_v41 = vmul.f32 %v1275_v30, %v621_v36  ;;  %v1166_v36 = vld [vmem:[%s1767_s7] sm:$0xff] }
 0x1cd   : > { %920 = vmatpush.bf16.msra.mxu2 %v1166_v36 }
 0x1ce   : > { %v1277_v44 = vpop.eup %1276  ;;  %v623_v46 = vadd.f32 %v1275_v30, %v622_v41 }
 0x1cf   : > { %v1279_v49 = vpop.eup %1278  ;;  %v1614_v51 = vadd.f32 1.0, %v1277_v44 }
 0x1d0   : > { %v627_v53 = vsel %vm626_vm13, %v1275_v30, %v623_v46  ;;  %v635_v54 = vmul.f32 %v1279_v49, %v1602_v31  ;;  %vm640_vm2 = vweird.f32 %v1279_v49  ;;  %vm737_vm13 = vcmask 1044480  }
 0x1d1   : > { %v632_v56 = vsel %vm629_vm14, %v631_v50, %v627_v53  ;;  %1280 = vrcp.f32 %v1614_v51  ;;  %vm641_vm7 = vmor %vm639_vm4, %vm640_vm2  ;;  %v658_v25 = vand.u32 2147483647, %v1614_v51  ;;  %v660_v26 = vand.u32 2147483648, %v1614_v51 }
 0x1d2   : > { %v636_v58 = vsub.f32 1.0, %v635_v54  ;;  %v664_v0 = vmul.f32 %v632_v56, %v513_v57  ;;  %vm654_vm14 = vweird.f32 %v1614_v51  ;;  %vm687_vm4 = vmand %vm681_vm11, %vm684_vm12 }
 0x1d3   : > { %vm659_vm2 = vcmp.eq.f32.partialorder %v658_v25, 8.507059e+37  ;;  %v661_v35 = vor.u32 1.1754944e-38, %v660_v26 }
 0x1d4   : > { %v637_v2 = vmul.f32 %v1279_v49, %v636_v58  ;;  %v688_v16 = vsel %vm1630_vm3, %v664_v0, 0.0 }
 0x1d5   : > { %v698_v28 = vmul.f32 %v1635_v5, %v688_v16  ;;  %v715_v31 = vmul.f32 %v1638_v6, %v688_v16  ;;  %v731_v37 = vmul.f32 %v1641_v7, %v688_v16  ;;  %v693_v43 = vmul.f32 %v692_v63, %v688_v16 }
 0x1d6   : > { %v638_v9 = vadd.f32 %v1279_v49, %v637_v2  ;;  %v748_v44 = vmul.f32 %v1644_v8, %v688_v16  ;;  %v765_v52 = vmul.f32 %v1652_v15, %v688_v16  ;;  %v782_v58 = vmul.f32 %v1660_v22, %v688_v16 }
 0x1d7   : > { %v1281_v11 = vpop.eup %1280  ;;  %v705_v38 = vrot.slane %v698_v28, 1  ;;  %v721_v48 = vrot.slane %v715_v31, 2  ;;  %v738_v56 = vrot.slane %v731_v37, 3 }
 0x1d8   : > { %v642_v17 = vsel %vm641_vm7, %v1279_v49, %v638_v9  ;;  %v650_v18 = vmul.f32 %v1281_v11, %v1614_v51  ;;  %vm655_vm15 = vweird.f32 %v1281_v11  ;;  %v755_v61 = vrot.slane %v748_v44, 4 }
 0x1d9   : > { %v647_v19 = vsel %vm644_vm8, %v646_v13, %v642_v17  ;;  %vm656_vm3 = vmor %vm654_vm14, %vm655_vm15  ;;  %v772_v9 = vrot.slane %v765_v52, 5 }
 0x1da   : > { %v665_v23 = vmul.f32 %v647_v19, %v515_v12  ;;  %v651_v24 = vsub.f32 1.0, %v650_v18 }
 0x1dc   : > { %v689_v21 = vsel %vm686_vm9, %v665_v23, 0.0  ;;  %v652_v29 = vmul.f32 %v1281_v11, %v651_v24 }
 0x1dd   : > { %v699_v30 = vmul.f32 %v1635_v5, %v689_v21  ;;  %v716_v32 = vmul.f32 %v1638_v6, %v689_v21  ;;  %v1673_v33 = vmul.f32 %v1641_v7, %v689_v21  ;;  %v749_v41 = vmul.f32 %v1644_v8, %v689_v21 }
 0x1de   : > { %v653_v34 = vadd.f32 %v1281_v11, %v652_v29  ;;  %v766_v45 = vmul.f32 %v1652_v15, %v689_v21  ;;  %v783_v53 = vmul.f32 %v1660_v22, %v689_v21  ;;  %v694_v16 = vmul.f32 %v692_v63, %v689_v21 }
 0x1df   : > { %v706_v39 = vrot.slane %v699_v30, 1  ;;  %v722_v40 = vrot.slane %v716_v32, 2  ;;  %v739_v49 = vrot.slane %v1673_v33, 3  ;;  %v756_v57 = vrot.slane %v749_v41, 4 }
 0x1e0   : > { %v657_v42 = vsel %vm656_vm3, %v1281_v11, %v653_v34  ;;  %v773_v62 = vrot.slane %v766_v45, 5  ;;  %v790_v10 = vrot.slane %v783_v53, 6 }
 0x1e1   : > { %v662_v46 = vsel %vm659_vm2, %v661_v35, %v657_v42  ;;  %v707_v47 = vsel %vm704_vm10, %v705_v38, %v706_v39  ;;  %v723_v54 = vsel %vm367_vm0, %v721_v48, %v722_v40  ;;  %v740_v3 = vsel %vm737_vm13, %v738_v56, %v739_v49 }
 0x1e2   : > { %v666_v50 = vmul.f32 %v662_v46, %v518_v20  ;;  %v712_v51 = vadd.f32 %v707_v47, %v693_v43  ;;  %v757_v14 = vsel %vm754_vm1, %v755_v61, %v756_v57  ;;  %v774_v19 = vsel %vm771_vm5, %v772_v9, %v773_v62 }
 0x1e4   : > { %v690_v59 = vsel %vm687_vm4, %v666_v50, 0.0  ;;  %v728_v60 = vadd.f32 %v723_v54, %v712_v51 }
 0x1e5   : > { %v700_v0 = vmul.f32 %v1635_v5, %v690_v59  ;;  %v717_v1 = vmul.f32 %v1638_v6, %v690_v59  ;;  %v733_v2 = vmul.f32 %v1641_v7, %v690_v59  ;;  %v750_v13 = vmul.f32 %v1644_v8, %v690_v59  ;;  %v1260_v8 = vld [vmem:[%s1766_s6] ss:$0 sm:$0xff] }
 0x1e6   : > { %v745_v4 = vadd.f32 %v740_v3, %v728_v60  ;;  %v789_v6 = vrot.slane %v782_v58, 6  ;;  %v767_v18 = vmul.f32 %v1652_v15, %v690_v59  ;;  %v784_v63 = vmul.f32 %v1660_v22, %v690_v59 }
 0x1e7   : > { %v708_v11 = vrot.slane %v700_v0, 1  ;;  %v724_v12 = vrot.slane %v717_v1, 2  ;;  %v741_v17 = vrot.slane %v733_v2, 3  ;;  %v758_v55 = vrot.slane %v750_v13, 4 }
 0x1e8   : > { %v762_v5 = vadd.f32 %v757_v14, %v745_v4  ;;  %v791_v25 = vsel %vm788_vm6, %v789_v6, %v790_v10  ;;  %v775_v15 = vrot.slane %v767_v18, 5  ;;  %v792_v31 = vrot.slane %v784_v63, 6  ;;  %v1261_v4 = vld [vmem:[%s1768_s8] ss:$0 sm:$0xff] }
 0x1e9   : > { %v709_v7 = vsel %vm704_vm10, %v706_v39, %v708_v11  ;;  %v725_v24 = vsel %vm367_vm0, %v722_v40, %v724_v12  ;;  %v742_v28 = vsel %vm737_vm13, %v739_v49, %v741_v17  ;;  %v759_v30 = vsel %vm754_vm1, %v756_v57, %v758_v55 }
 0x1ea   : > { %v713_v20 = vadd.f32 %v709_v7, %v694_v16  ;;  %v779_v23 = vadd.f32 %v774_v19, %v762_v5  ;;  %v776_v34 = vsel %vm771_vm5, %v773_v62, %v775_v15  ;;  %v793_v22 = vsel %vm788_vm6, %v790_v10, %v792_v31 }
 0x1ec   : > { %v729_v26 = vadd.f32 %v725_v24, %v713_v20  ;;  %v796_v27 = vadd.f32 %v791_v25, %v779_v23 }
 0x1ee   : > { %v746_v21 = vadd.f32 %v742_v28, %v729_v26  ;;  %v802_v29 = vadd.f32 %v1260_v8, %v796_v27 }
 0x1f0   : > { %v763_v32 = vadd.f32 %v759_v30, %v746_v21  ;;  %v1110_v33 = vmul.f32 -1.442695, %v802_v29 }
 0x1f2   : > { %v780_v35 = vadd.f32 %v776_v34, %v763_v32  ;;  %1282 = vpow2.f32 %v1110_v33 }
 0x1f4   : > { %v797_v36 = vadd.f32 %v793_v22, %v780_v35 }
 0x1f6   : > { %v803_v37 = vadd.f32 %v1260_v8, %v797_v36 }
 0x1f8   : > { %v1283_v38 = vpop.eup %1282  ;;  %v1111_v39 = vmul.f32 -1.442695, %v803_v37 }
 0x1f9   : > { %v810_v40 = vadd.f32 1.0, %v1283_v38 }
 0x1fa   : > { %1284 = vpow2.f32 %v1111_v39 }
 0x1fb   : > { %1286 = vrcp.f32 %v810_v40  ;;  %v823_v50 = vand.u32 2147483648, %v810_v40  ;;  %vm817_vm7 = vweird.f32 %v810_v40  ;;  %v821_v51 = vand.u32 2147483647, %v810_v40 }
 0x1fd   : > { %v824_v58 = vor.u32 1.1754944e-38, %v823_v50  ;;  %vm822_vm10 = vcmp.eq.f32.partialorder %v821_v51, 8.507059e+37 }
 0x200   : > { %v1285_v41 = vpop.eup %1284 }
 0x201   : > { %v1287_v42 = vpop.eup %1286  ;;  %v811_v43 = vadd.f32 1.0, %v1285_v41 }
 0x202   : > { %v813_v44 = vmul.f32 %v1287_v42, %v810_v40  ;;  %vm818_vm0 = vweird.f32 %v1287_v42 }
 0x203   : > { %1288 = vrcp.f32 %v811_v43  ;;  %vm819_vm8 = vmor %vm817_vm7, %vm818_vm0  ;;  %v838_v53 = vand.u32 2147483648, %v811_v43  ;;  %v836_v57 = vand.u32 2147483647, %v811_v43  ;;  %vm832_vm11 = vweird.f32 %v811_v43 }
 0x204   : > { %v814_v45 = vsub.f32 1.0, %v813_v44 }
 0x205   : > { %v839_v61 = vor.u32 1.1754944e-38, %v838_v53  ;;  %vm837_vm13 = vcmp.eq.f32.partialorder %v836_v57, 8.507059e+37 }
 0x206   : > { %v815_v46 = vmul.f32 %v1287_v42, %v814_v45 }
 0x208   : > { %v816_v48 = vadd.f32 %v1287_v42, %v815_v46 }
 0x209   : > { %v1289_v47 = vpop.eup %1288 }
 0x20a   : > { %v828_v49 = vmul.f32 %v1289_v47, %v811_v43  ;;  %v820_v54 = vsel %vm819_vm8, %v1287_v42, %v816_v48  ;;  %vm833_vm9 = vweird.f32 %v1289_v47 }
 0x20b   : > { %v825_v60 = vsel %vm822_vm10, %v824_v58, %v820_v54  ;;  %vm834_vm12 = vmor %vm832_vm11, %vm833_vm9 }
 0x20c   : > { %v829_v52 = vsub.f32 1.0, %v828_v49  ;;  %v842_v1 = vmul.f32 %v825_v60, %v802_v29 }
 0x20e   : > { %v830_v56 = vmul.f32 %v1289_v47, %v829_v52 }
 0x210   : > { %v831_v59 = vadd.f32 %v1289_v47, %v830_v56 }
 0x212   : > { %v835_v62 = vsel %vm834_vm12, %v1289_v47, %v831_v59 }
 0x213   : > { %v840_v0 = vsel %vm837_vm13, %v839_v61, %v835_v62 }
 0x214   : > { %v843_v2 = vmul.f32 %v840_v0, %v803_v37 }
 0x216   : > { %v844_v3 = vpack.c.bf16 %v843_v2, %v842_v1 }
 0x218   : > { %921 = vmatmul.bf16.vlgmr.msra.gmra.mxu2 %v844_v3 }
 0x29b   : > { %v922_v9 = vpop.f32.mrf.mxu2 }
 0x29c   : > { %v923_v10 = vadd.f32 %v1261_v4, %v922_v9 }
 0x29e   : > { %927 = vst [vmem:[%s349_s24] sm:$0xff] %v923_v10 }
 0x2a3   : > { %v924_v11 = vpop.f32.mrf.mxu2 }
 0x2a4   : > { %v925_v12 = vadd.f32 %v1261_v4, %v924_v11 }
 0x2a6   : > { %928 = vst [vmem:[%s349_s24 + $0x8] sm:$0xff] %v925_v12 }
 0x2a7   : > { %1317 = shalt.err (!%p1314_p7)
}
 0x2a8   : > { %s1387_s0 = smov 128   ;;  %s1388_s20 = smov 8  }
 0x2a9   : > { %1184 = dma.vmem_to_hbm [thread:$0]  (%p1490_p3), %s945_s1, 256, %s947_s2, %s930_s12, %s1387_s0, %s1387_s0, %s1388_s20  }
 0x2aa PF: > { %p1190_p9 = scmp.ge.s32.totalorder %s1384_s16, 2  ;;  %s961_s21 = sand.u32 1, %s1356_s30  }
 0x2ab   : > { %s962_s24 = scalar_lea.sflag [#allocation3], %s961_s21 }
 0x2ac   : > { %p1187_p10 = pnand %p1190_p9, %p1499_p8 }
 0x2ae   : > { %p1188_p11 = pneg %p1187_p10 }
 0x2b0   : > { %1351 = dma.done.wait (%p1188_p11), %s962_s24, 256  }
 0x2b1   : > { %1353 = vsyncadd (%p1188_p11), %s962_s24, 4294967040  ;;  %s22_s16 = sadd.s32 1, %s1384_s16   ;;  %s1786_s12 = sld [smem:[#allocation5_spill]] }
 0x2b2   : > { %p19_p12 = scmp.ge.s32.totalorder %s22_s16, 10   ;;  %s1787_s14 = sld [smem:[#allocation6_spill]] }
 0x2b3   : > { %s1788_s1 = sld [smem:[#allocation7_spill]]  ;;  %s1789_s30 = smov %s1360_s10 }
 0x2b4   : > { %s1790_s10 = smov %s1364_s11  ;;  %s1791_s11 = smov %s1508_s27 }
 0x2b5   : > { %s1792_s13 = smov %s1380_s15  ;;  %21 = sbr.rel (!%p19_p12) target bundleno = 9 (0x9), region = 91 }
 0x2b9   : > { %s1793_s15 = smov %s1788_s1 }
 0x2ba   :  { %968 = vsyncpa [#allocation3], 1 }
 0x2bb   :  { %970 = vsyncpa [#allocation3 + $0x1], 1 }

</bundles_post_ra>
